<compile_context>
chip_gen: v7x
topology: tpu7x:2x2x1
jax: 0.10.0
libtpu: 0.0.40
codegen_flags: <defaults>
</compile_context>

<pallas_src>
import math
import functools

import jax
import jax.numpy as jnp
import numpy as np
from jax.experimental import pallas as pl
from jax.experimental.pallas import tpu as pltpu

# ----------------------------- hyper-parameters ------------------------------
BATCH = 2
SEQ = 8
DIM = 32
N_HEADS = 4
HEAD_DIM = DIM // N_HEADS            # 8
Q_RANK = 4
RANK = 2
HIDDEN = math.floor(8 / 3 * DIM)     # T6MLP hidden dim (85)
HIDDEN_PAD = 128                     # hidden padded to one lane tile
ROPE_THETA = 500000.0
RMS_EPS = float(jnp.finfo(jnp.float32).eps)  # F.rms_norm default eps (eps=None)
SM_SCALE = 1.0 / math.sqrt(HEAD_DIM)

Q_W = N_HEADS * Q_RANK * HEAD_DIM    # 128  expanded q-factor width
KV_W = N_HEADS * RANK * HEAD_DIM     # 64   expanded k / v factor width
SLAB = Q_W + 2 * KV_W                # 256  one [q|k|v] slab width


# --------------------------------- kernel ------------------------------------
def _rms_norm(v):
    return v * jax.lax.rsqrt(jnp.mean(v * v, axis=-1, keepdims=True) + RMS_EPS)


def t6_block_kernel(x_ref, cos_ref, sin_ref,
                    wfact_ref, rsum_ref, wo_ref, wfc_ref, wproj_ref,
                    out_ref):
    f32 = jnp.float32
    bf16 = jnp.bfloat16
    dot = functools.partial(jnp.dot, preferred_element_type=f32)

    x = x_ref[...].astype(f32)                         # (S, D) — one batch element
    xn = _rms_norm(x)

    # Fused factor projections (bf16 operands on the MXU, f32 accumulation).
    # Column layout (3 slabs of 256 lanes each):
    #   [ A_q(128) | A_k(64) | A_v(64) ]   A factors, lane-expanded over head_dim
    #   [ B_q(128) | B_k(64) | B_v(64) ]   B factors, tiled over heads
    #   [ Bq_rot   | Bk_rot  | zeros   ]   pair-rotated B factors (RoPE imag part)
    fact = dot(xn.astype(bf16), wfact_ref[...])        # (S, 3*SLAB) f32
    a_slab = fact[:, 0:SLAB]
    b_slab = fact[:, SLAB:2 * SLAB]
    brot_slab = fact[:, 2 * SLAB:3 * SLAB]

    # RoPE on the B factors.  The v region has cos=1 / sin=0 (passthrough),
    # coupled with the zero rot-v columns of w_fact.
    b_roped = (b_slab * cos_ref[...].astype(f32)
               + brot_slab * sin_ref[...].astype(f32))
    prod = a_slab * b_roped                            # (S, SLAB) f32

    # Rank contraction: one constant matmul.  rsum holds exact {0, 1/q_rank,
    # 1/rank} values so the bf16->f32 promotion here is lossless.
    qkv = dot(prod, rsum_ref[...].astype(f32))         # (S, 3*D): [q | k | v]

    q = qkv[:, 0:DIM].reshape(SEQ, N_HEADS, HEAD_DIM)
    k = qkv[:, DIM:2 * DIM].reshape(SEQ, N_HEADS, HEAD_DIM)
    v = qkv[:, 2 * DIM:3 * DIM].reshape(SEQ, N_HEADS, HEAD_DIM)

    # Head-batched attention: single scores matmul, single softmax, single PV.
    scores = jnp.einsum('qhd,khd->hqk', q, k,
                        preferred_element_type=f32) * SM_SCALE      # (H, S, S)
    row = jax.lax.broadcasted_iota(jnp.int32, (SEQ, SEQ), 0)
    col = jax.lax.broadcasted_iota(jnp.int32, (SEQ, SEQ), 1)
    scores = jnp.where((col <= row)[None, :, :], scores, -1e30)     # causal mask (in-kernel)
    m = jnp.max(scores, axis=-1, keepdims=True)
    e = jnp.exp(scores - m)
    probs = e * pl.reciprocal(jnp.sum(e, axis=-1, keepdims=True), approx=True)
    o = jnp.einsum('hqk,khd->qhd', probs, v, preferred_element_type=f32)
    attn = dot(o.reshape(SEQ, N_HEADS * HEAD_DIM).astype(bf16), wo_ref[...])

    h = x + attn

    # SwiGLU MLP (fc1|fc2 fused into one matmul, hidden padded to 128 lanes).
    hn = _rms_norm(h)
    fc = dot(hn.astype(bf16), wfc_ref[...])            # (S, 2*HIDDEN_PAD) f32
    gated = jax.nn.silu(fc[:, :HIDDEN_PAD]) * fc[:, HIDDEN_PAD:2 * HIDDEN_PAD]
    mlp = dot(gated.astype(bf16), wproj_ref[...])      # (S, D) f32

    out_ref[...] = (h + mlp).astype(out_ref.dtype)


# ---------------------- host-side constant folding ---------------------------
def _rotate_pairs(w):
    # interleaved (re, im) column pairs -> (-im, re); exact (no matmul rounding)
    w2 = w.reshape(*w.shape[:-1], w.shape[-1] // 2, 2)
    return jnp.stack([-w2[..., 1], w2[..., 0]], axis=-1).reshape(w.shape)


def _build_constants(params, cos, sin):
    bf16 = jnp.bfloat16
    seq = cos.shape[0]

    # --- fused factor projection weight (D, 3*SLAB), bf16 ---
    waq = jnp.repeat(params['W_A_q'].T, HEAD_DIM, axis=1)        # (D, 128)
    wak = jnp.repeat(params['W_A_k'].T, HEAD_DIM, axis=1)        # (D, 64)
    wav = jnp.repeat(params['W_A_v'].T, HEAD_DIM, axis=1)        # (D, 64)

    wbq = params['W_B_q'].T                                      # (D, Rq*Dh)
    wbk = params['W_B_k'].T                                      # (D, R*Dh)
    wbv = params['W_B_v'].T
    wbq_t = jnp.tile(wbq, (1, N_HEADS))                          # (D, 128)
    wbk_t = jnp.tile(wbk, (1, N_HEADS))                          # (D, 64)
    wbv_t = jnp.tile(wbv, (1, N_HEADS))                          # (D, 64)
    wbq_r = jnp.tile(_rotate_pairs(wbq), (1, N_HEADS))
    wbk_r = jnp.tile(_rotate_pairs(wbk), (1, N_HEADS))
    zeros_v = jnp.zeros_like(wbv_t)                              # keeps slabs 128-lane aligned

    w_fact = jnp.concatenate(
        [waq, wak, wav, wbq_t, wbk_t, wbv_t, wbq_r, wbk_r, zeros_v],
        axis=1).astype(bf16)

    # --- rank-sum constant (SLAB, 3*D); 1/q_rank, 1/rank folded (exact bf16);
    #     the softmax 1/sqrt(Dh) scale is applied in-kernel in f32. ---
    eye_h = np.eye(N_HEADS, dtype=np.float32)
    eye_d = np.eye(HEAD_DIM, dtype=np.float32)
    rs_q = np.kron(eye_h, np.kron(np.ones((Q_RANK, 1), np.float32), eye_d))
    rs_kv = np.kron(eye_h, np.kron(np.ones((RANK, 1), np.float32), eye_d))
    rsum = np.zeros((SLAB, 3 * DIM), np.float32)
    rsum[:Q_W, :DIM] = rs_q / Q_RANK
    rsum[Q_W:Q_W + KV_W, DIM:2 * DIM] = rs_kv / RANK
    rsum[Q_W + KV_W:, 2 * DIM:] = rs_kv / RANK
    rsum = jnp.asarray(rsum).astype(bf16)

    # --- RoPE cos/sin tables in slab layout (q|k roped, v passthrough) ---
    cos_rep = jnp.repeat(cos, 2, axis=-1)                        # (S, Dh)
    sin_rep = jnp.repeat(sin, 2, axis=-1)
    cos_tab = jnp.concatenate(
        [jnp.tile(cos_rep, (1, N_HEADS * Q_RANK)),
         jnp.tile(cos_rep, (1, N_HEADS * RANK)),
         jnp.ones((seq, KV_W), jnp.float32)], axis=1).astype(bf16)   # (S, SLAB)
    sin_tab = jnp.concatenate(
        [jnp.tile(sin_rep, (1, N_HEADS * Q_RANK)),
         jnp.tile(sin_rep, (1, N_HEADS * RANK)),
         jnp.zeros((seq, KV_W), jnp.float32)], axis=1).astype(bf16)

    # --- attention output projection & padded fused MLP weights (bf16) ---
    wo = params['wo'].T.astype(bf16)                             # (H*Dh, D)
    w_fc = jnp.zeros((DIM, 2 * HIDDEN_PAD), jnp.float32)
    w_fc = w_fc.at[:, :HIDDEN].set(params['c_fc1'].T)
    w_fc = w_fc.at[:, HIDDEN_PAD:HIDDEN_PAD + HIDDEN].set(params['c_fc2'].T)
    w_fc = w_fc.astype(bf16)
    w_proj = jnp.zeros((HIDDEN_PAD, DIM), jnp.float32)
    w_proj = w_proj.at[:HIDDEN, :].set(params['c_proj'].T)
    w_proj = w_proj.astype(bf16)

    return cos_tab, sin_tab, w_fact, rsum, wo, w_fc, w_proj


# ------------------------------- wrapper --------------------------------------
def make_t6_block(params, cos, sin, batch, seq):
    """Builds fused constants ONCE and returns a jitted forward fn x -> out."""
    consts = _build_constants(params, cos, sin)
    bs = batch * seq

    grid_spec = pltpu.PrefetchScalarGridSpec(
        num_scalar_prefetch=0,
        grid=(batch,),  # one program per batch element; parallel across TCs on v7x
        in_specs=[
            pl.BlockSpec((seq, DIM), lambda b: (b, 0)),             # x rows of batch b
            pl.BlockSpec((seq, SLAB), lambda b: (0, 0)),            # cos table
            pl.BlockSpec((seq, SLAB), lambda b: (0, 0)),            # sin table
            pl.BlockSpec((DIM, 3 * SLAB), lambda b: (0, 0)),        # fused factor weight
            pl.BlockSpec((SLAB, 3 * DIM), lambda b: (0, 0)),        # rank-sum constant
            pl.BlockSpec((DIM, DIM), lambda b: (0, 0)),             # wo
            pl.BlockSpec((DIM, 2 * HIDDEN_PAD), lambda b: (0, 0)),  # fused fc1|fc2
            pl.BlockSpec((HIDDEN_PAD, DIM), lambda b: (0, 0)),      # c_proj (padded)
        ],
        out_specs=pl.BlockSpec((seq, DIM), lambda b: (b, 0)),
    )

    kernel_fn = pl.pallas_call(
        t6_block_kernel,
        out_shape=jax.ShapeDtypeStruct((bs, DIM), jnp.float32),
        grid_spec=grid_spec,
        compiler_params=pltpu.CompilerParams(
            dimension_semantics=("parallel",)),
    )

    @jax.jit
    def fwd(x):
        out2d = kernel_fn(x.reshape(bs, DIM), *consts)
        return out2d.reshape(batch, seq, DIM)

    return fwd


# ------------------------- parameters & RoPE tables ---------------------------
def init_params(key):
    # NOTE: the PyTorch module zero-initializes wo.weight and c_proj.weight;
    # here we use small random values so the full compute path is exercised.
    def dense(k, out_f, in_f):
        return (1.0 / math.sqrt(in_f)) * jax.random.normal(
            k, (out_f, in_f), jnp.float32)

    ks = jax.random.split(key, 10)
    return {
        'W_A_q': dense(ks[0], N_HEADS * Q_RANK, DIM),
        'W_A_k': dense(ks[1], N_HEADS * RANK, DIM),
        'W_A_v': dense(ks[2], N_HEADS * RANK, DIM),
        'W_B_q': dense(ks[3], Q_RANK * HEAD_DIM, DIM),
        'W_B_k': dense(ks[4], RANK * HEAD_DIM, DIM),
        'W_B_v': dense(ks[5], RANK * HEAD_DIM, DIM),
        'wo':    dense(ks[6], DIM, N_HEADS * HEAD_DIM),
        'c_fc1': dense(ks[7], HIDDEN, DIM),
        'c_fc2': dense(ks[8], HIDDEN, DIM),
        'c_proj': dense(ks[9], DIM, HIDDEN),
    }


def rope_tables(seq, dh, theta):
    freqs = 1.0 / (theta ** (jnp.arange(0, dh, 2, dtype=jnp.float32) / dh))
    t = jnp.arange(seq, dtype=jnp.float32)
    ang = jnp.outer(t, freqs)                  # (S, dh//2)
    return jnp.cos(ang), jnp.sin(ang)


# ------------------------------ pure-JAX reference ----------------------------
def t6_block_ref(x, params, mask, cos, sin):
    def rms(v):
        return v * jax.lax.rsqrt(jnp.mean(v * v, -1, keepdims=True) + RMS_EPS)

    B, S, D = x.shape
    xn = rms(x)
    aq = (xn @ params['W_A_q'].T).reshape(B, S, N_HEADS, Q_RANK)
    ak = (xn @ params['W_A_k'].T).reshape(B, S, N_HEADS, RANK)
    av = (xn @ params['W_A_v'].T).reshape(B, S, N_HEADS, RANK)
    bq = (xn @ params['W_B_q'].T).reshape(B, S, Q_RANK, HEAD_DIM)
    bk = (xn @ params['W_B_k'].T).reshape(B, S, RANK, HEAD_DIM)
    bv = (xn @ params['W_B_v'].T).reshape(B, S, RANK, HEAD_DIM)

    def rope(b):
        b2 = b.reshape(*b.shape[:-1], HEAD_DIM // 2, 2)
        re, im = b2[..., 0], b2[..., 1]
        c = cos[None, :, None, :]
        s = sin[None, :, None, :]
        return jnp.stack([re * c - im * s, re * s + im * c], axis=-1).reshape(b.shape)

    bq, bk = rope(bq), rope(bk)
    q = jnp.einsum('bshr,bsrd->bshd', aq, bq) / Q_RANK
    k = jnp.einsum('bshr,bsrd->bshd', ak, bk) / RANK
    v = jnp.einsum('bshr,bsrd->bshd', av, bv) / RANK
    scores = jnp.einsum('bqhd,bkhd->bhqk', q, k) / math.sqrt(HEAD_DIM)
    scores = scores + mask[None, None]
    probs = jax.nn.softmax(scores, axis=-1)
    out = jnp.einsum('bhqk,bkhd->bqhd', probs, v).reshape(B, S, N_HEADS * HEAD_DIM)
    h = x + out @ params['wo'].T
    hn = rms(h)
    mlp = (jax.nn.silu(hn @ params['c_fc1'].T) * (hn @ params['c_fc2'].T)) @ params['c_proj'].T
    return h + mlp


# ----------------------------------- main --------------------------------------
if __name__ == "__main__":
    key = jax.random.PRNGKey(0)
    kx, kp = jax.random.split(key)

    x = jax.random.normal(kx, (BATCH, SEQ, DIM), jnp.float32)
    params = init_params(kp)
    cos, sin = rope_tables(SEQ, HEAD_DIM, ROPE_THETA)

    fwd = make_t6_block(params, cos, sin, BATCH, SEQ)   # constants folded once
    out = jax.block_until_ready(fwd(x))

    # reference (start_pos = 0 prefill, per-batch causal mask), pure f32
    mask = jnp.where(jnp.tril(jnp.ones((SEQ, SEQ), bool)), 0.0, -1e9).astype(jnp.float32)
    ref = t6_block_ref(x, params, mask, cos, sin)

    assert out.shape == (BATCH, SEQ, DIM)
    assert bool(jnp.all(jnp.isfinite(out)))
    # bf16 storage of the fused constants (per perf review) dominates the error;
    # the f32-constant variant of this kernel matches to ~1e-5.
    assert bool(jnp.allclose(out, ref, atol=5e-2, rtol=5e-2)), \
        f"max abs err = {float(jnp.max(jnp.abs(out - ref)))}"

    print("KERNEL_OK")
</pallas_src>

<mosaic_0001>
module attributes {stable_mosaic.version = 11 : i64} {
  func.func @t6_block_kernel(%arg0: i32, %arg1: memref<8x32xf32, #tpu.memory_space<vmem>>, %arg2: memref<8x256xbf16, #tpu.memory_space<vmem>>, %arg3: memref<8x256xbf16, #tpu.memory_space<vmem>>, %arg4: memref<32x768xbf16, #tpu.memory_space<vmem>>, %arg5: memref<256x96xbf16, #tpu.memory_space<vmem>>, %arg6: memref<32x32xbf16, #tpu.memory_space<vmem>>, %arg7: memref<32x256xbf16, #tpu.memory_space<vmem>>, %arg8: memref<128x32xbf16, #tpu.memory_space<vmem>>, %arg9: memref<8x32xf32, #tpu.memory_space<vmem>>) attributes {dimension_semantics = [#tpu.dimension_semantics<parallel>], iteration_bounds = array<i64: 2>, scalar_prefetch = 0 : i64, scratch_operands = 0 : i64, tpu.core_type = #tpu.core_type<tc>, window_params = [{transform_indices = @transform_0, window_bounds = array<i64: 8, 32>}, {pipeline_mode = #tpu.pipeline_mode<synchronous>, transform_indices = @transform_1, window_bounds = array<i64: 8, 256>}, {pipeline_mode = #tpu.pipeline_mode<synchronous>, transform_indices = @transform_2, window_bounds = array<i64: 8, 256>}, {pipeline_mode = #tpu.pipeline_mode<synchronous>, transform_indices = @transform_3, window_bounds = array<i64: 32, 768>}, {pipeline_mode = #tpu.pipeline_mode<synchronous>, transform_indices = @transform_4, window_bounds = array<i64: 256, 96>}, {pipeline_mode = #tpu.pipeline_mode<synchronous>, transform_indices = @transform_5, window_bounds = array<i64: 32, 32>}, {pipeline_mode = #tpu.pipeline_mode<synchronous>, transform_indices = @transform_6, window_bounds = array<i64: 32, 256>}, {pipeline_mode = #tpu.pipeline_mode<synchronous>, transform_indices = @transform_7, window_bounds = array<i64: 128, 32>}, {transform_indices = @transform_8, window_bounds = array<i64: 8, 32>}]} {
    %c0 = arith.constant 0 : index
    %c0_0 = arith.constant 0 : index
    %0 = vector.load %arg1[%c0, %c0_0] : memref<8x32xf32, #tpu.memory_space<vmem>>, vector<8x32xf32>
    %1 = arith.mulf %0, %0 : vector<8x32xf32>
    %cst = arith.constant dense<0.000000e+00> : vector<8xf32>
    %2 = vector.multi_reduction <add>, %1, %cst [1] : vector<8x32xf32> to vector<8xf32>
    %3 = vector.shape_cast %2 : vector<8xf32> to vector<8x1xf32>
    %cst_1 = arith.constant 3.200000e+01 : f32
    %4 = vector.broadcast %cst_1 : f32 to vector<8x1xf32>
    %5 = arith.divf %3, %4 : vector<8x1xf32>
    %cst_2 = arith.constant 1.1920929E-7 : f32
    %6 = vector.broadcast %cst_2 : f32 to vector<8x1xf32>
    %7 = arith.addf %5, %6 : vector<8x1xf32>
    %8 = math.rsqrt %7 : vector<8x1xf32>
    %9 = vector.broadcast %8 : vector<8x1xf32> to vector<8x32xf32>
    %10 = arith.mulf %0, %9 : vector<8x32xf32>
    %11 = arith.truncf %10 : vector<8x32xf32> to vector<8x32xbf16>
    %c0_3 = arith.constant 0 : index
    %c0_4 = arith.constant 0 : index
    %12 = vector.load %arg4[%c0_3, %c0_4] : memref<32x768xbf16, #tpu.memory_space<vmem>>, vector<32x768xbf16>
    %cst_5 = arith.constant dense<0.000000e+00> : vector<8x768xf32>
    %13 = tpu.matmul %11, %12, %cst_5 {dimension_numbers = #tpu.dot_dimension_numbers<[1], [0], [0], [1], [0, 0, 1, 1], [], []>} : vector<8x32xbf16>, vector<32x768xbf16>, vector<8x768xf32> -> vector<8x768xf32>
    %14 = vector.extract_strided_slice %13 {offsets = [0, 0], sizes = [8, 256], strides = [1, 1]} : vector<8x768xf32> to vector<8x256xf32>
    %15 = vector.extract_strided_slice %13 {offsets = [0, 256], sizes = [8, 256], strides = [1, 1]} : vector<8x768xf32> to vector<8x256xf32>
    %16 = vector.extract_strided_slice %13 {offsets = [0, 512], sizes = [8, 256], strides = [1, 1]} : vector<8x768xf32> to vector<8x256xf32>
    %c0_6 = arith.constant 0 : index
    %c0_7 = arith.constant 0 : index
    %17 = vector.load %arg2[%c0_6, %c0_7] : memref<8x256xbf16, #tpu.memory_space<vmem>>, vector<8x256xbf16>
    %18 = arith.extf %17 : vector<8x256xbf16> to vector<8x256xf32>
    %19 = arith.mulf %15, %18 : vector<8x256xf32>
    %c0_8 = arith.constant 0 : index
    %c0_9 = arith.constant 0 : index
    %20 = vector.load %arg3[%c0_8, %c0_9] : memref<8x256xbf16, #tpu.memory_space<vmem>>, vector<8x256xbf16>
    %21 = arith.extf %20 : vector<8x256xbf16> to vector<8x256xf32>
    %22 = arith.mulf %16, %21 : vector<8x256xf32>
    %23 = arith.addf %19, %22 : vector<8x256xf32>
    %24 = arith.mulf %14, %23 : vector<8x256xf32>
    %c0_10 = arith.constant 0 : index
    %c0_11 = arith.constant 0 : index
    %25 = vector.load %arg5[%c0_10, %c0_11] : memref<256x96xbf16, #tpu.memory_space<vmem>>, vector<256x96xbf16>
    %26 = arith.extf %25 : vector<256x96xbf16> to vector<256x96xf32>
    %cst_12 = arith.constant dense<0.000000e+00> : vector<8x96xf32>
    %27 = tpu.matmul %24, %26, %cst_12 {dimension_numbers = #tpu.dot_dimension_numbers<[1], [0], [0], [1], [0, 0, 1, 1], [], []>} : vector<8x256xf32>, vector<256x96xf32>, vector<8x96xf32> -> vector<8x96xf32>
    %28 = vector.extract_strided_slice %27 {offsets = [0, 0], sizes = [8, 32], strides = [1, 1]} : vector<8x96xf32> to vector<8x32xf32>
    %29 = vector.shape_cast %28 : vector<8x32xf32> to vector<8x4x8xf32>
    %30 = vector.extract_strided_slice %27 {offsets = [0, 32], sizes = [8, 32], strides = [1, 1]} : vector<8x96xf32> to vector<8x32xf32>
    %31 = vector.shape_cast %30 : vector<8x32xf32> to vector<8x4x8xf32>
    %32 = vector.extract_strided_slice %27 {offsets = [0, 64], sizes = [8, 32], strides = [1, 1]} : vector<8x96xf32> to vector<8x32xf32>
    %33 = vector.shape_cast %32 : vector<8x32xf32> to vector<8x4x8xf32>
    "tpu.trace_start"() <{level = 10 : i32, message = "qhd,khd->hqk"}> : () -> ()
    %cst_13 = arith.constant dense<0.000000e+00> : vector<4x8x8xf32>
    %34 = tpu.matmul %29, %31, %cst_13 {dimension_numbers = #tpu.dot_dimension_numbers<[2], [2], [0], [0], [0, 1, 0, 0, 1, 0], [1], [1]>} : vector<8x4x8xf32>, vector<8x4x8xf32>, vector<4x8x8xf32> -> vector<4x8x8xf32>
    "tpu.trace_stop"() : () -> ()
    %cst_14 = arith.constant 0.353553385 : f32
    %35 = vector.broadcast %cst_14 : f32 to vector<4x8x8xf32>
    %36 = arith.mulf %34, %35 : vector<4x8x8xf32>
    %37 = tpu.iota {dimensions = array<i32: 0>} : vector<8x8xi32>
    %38 = tpu.iota {dimensions = array<i32: 1>} : vector<8x8xi32>
    %39 = arith.cmpi sle, %38, %37 : vector<8x8xi32>
    %40 = vector.shape_cast %39 : vector<8x8xi1> to vector<1x8x8xi1>
    %cst_15 = arith.constant -1.000000e+30 : f32
    %41 = vector.shape_cast %40 : vector<1x8x8xi1> to vector<1x8x8xi1>
    %42 = vector.broadcast %41 : vector<1x8x8xi1> to vector<4x8x8xi1>
    %43 = vector.broadcast %cst_15 : f32 to vector<4x8x8xf32>
    %44 = arith.select %42, %36, %43 : vector<4x8x8xi1>, vector<4x8x8xf32>
    %cst_16 = arith.constant dense<0xFF800000> : vector<4x8xf32>
    %45 = vector.multi_reduction <maximumf>, %44, %cst_16 [2] : vector<4x8x8xf32> to vector<4x8xf32>
    %46 = vector.shape_cast %45 : vector<4x8xf32> to vector<4x8x1xf32>
    %47 = vector.broadcast %46 : vector<4x8x1xf32> to vector<4x8x8xf32>
    %48 = arith.subf %44, %47 : vector<4x8x8xf32>
    %49 = math.exp %48 : vector<4x8x8xf32>
    %cst_17 = arith.constant dense<0.000000e+00> : vector<4x8xf32>
    %50 = vector.multi_reduction <add>, %49, %cst_17 [2] : vector<4x8x8xf32> to vector<4x8xf32>
    %51 = vector.shape_cast %50 : vector<4x8xf32> to vector<4x8x1xf32>
    %52 = tpu.reciprocal %51 {approx = true} : vector<4x8x1xf32> -> vector<4x8x1xf32>
    %53 = vector.broadcast %52 : vector<4x8x1xf32> to vector<4x8x8xf32>
    %54 = arith.mulf %49, %53 : vector<4x8x8xf32>
    "tpu.trace_start"() <{level = 10 : i32, message = "hqk,khd->qhd"}> : () -> ()
    %cst_18 = arith.constant dense<0.000000e+00> : vector<4x8x8xf32>
    %55 = tpu.matmul %33, %54, %cst_18 {dimension_numbers = #tpu.dot_dimension_numbers<[0], [2], [2], [1], [0, 1, 0, 2, 1, 1], [1], [0]>} : vector<8x4x8xf32>, vector<4x8x8xf32>, vector<4x8x8xf32> -> vector<4x8x8xf32>
    %56 = tpu.transpose %55, [2, 0, 1] : vector<4x8x8xf32> -> vector<8x4x8xf32>
    "tpu.trace_stop"() : () -> ()
    %57 = vector.shape_cast %56 : vector<8x4x8xf32> to vector<8x32xf32>
    %58 = arith.truncf %57 : vector<8x32xf32> to vector<8x32xbf16>
    %c0_19 = arith.constant 0 : index
    %c0_20 = arith.constant 0 : index
    %59 = vector.load %arg6[%c0_19, %c0_20] : memref<32x32xbf16, #tpu.memory_space<vmem>>, vector<32x32xbf16>
    %cst_21 = arith.constant dense<0.000000e+00> : vector<8x32xf32>
    %60 = tpu.matmul %58, %59, %cst_21 {dimension_numbers = #tpu.dot_dimension_numbers<[1], [0], [0], [1], [0, 0, 1, 1], [], []>} : vector<8x32xbf16>, vector<32x32xbf16>, vector<8x32xf32> -> vector<8x32xf32>
    %61 = arith.addf %0, %60 : vector<8x32xf32>
    %62 = arith.mulf %61, %61 : vector<8x32xf32>
    %cst_22 = arith.constant dense<0.000000e+00> : vector<8xf32>
    %63 = vector.multi_reduction <add>, %62, %cst_22 [1] : vector<8x32xf32> to vector<8xf32>
    %64 = vector.shape_cast %63 : vector<8xf32> to vector<8x1xf32>
    %cst_23 = arith.constant 3.200000e+01 : f32
    %65 = vector.broadcast %cst_23 : f32 to vector<8x1xf32>
    %66 = arith.divf %64, %65 : vector<8x1xf32>
    %cst_24 = arith.constant 1.1920929E-7 : f32
    %67 = vector.broadcast %cst_24 : f32 to vector<8x1xf32>
    %68 = arith.addf %66, %67 : vector<8x1xf32>
    %69 = math.rsqrt %68 : vector<8x1xf32>
    %70 = vector.broadcast %69 : vector<8x1xf32> to vector<8x32xf32>
    %71 = arith.mulf %61, %70 : vector<8x32xf32>
    %72 = arith.truncf %71 : vector<8x32xf32> to vector<8x32xbf16>
    %c0_25 = arith.constant 0 : index
    %c0_26 = arith.constant 0 : index
    %73 = vector.load %arg7[%c0_25, %c0_26] : memref<32x256xbf16, #tpu.memory_space<vmem>>, vector<32x256xbf16>
    %cst_27 = arith.constant dense<0.000000e+00> : vector<8x256xf32>
    %74 = tpu.matmul %72, %73, %cst_27 {dimension_numbers = #tpu.dot_dimension_numbers<[1], [0], [0], [1], [0, 0, 1, 1], [], []>} : vector<8x32xbf16>, vector<32x256xbf16>, vector<8x256xf32> -> vector<8x256xf32>
    %75 = vector.extract_strided_slice %74 {offsets = [0, 0], sizes = [8, 128], strides = [1, 1]} : vector<8x256xf32> to vector<8x128xf32>
    %76 = arith.negf %75 : vector<8x128xf32>
    %77 = math.exp %76 : vector<8x128xf32>
    %cst_28 = arith.constant 1.000000e+00 : f32
    %78 = vector.broadcast %cst_28 : f32 to vector<8x128xf32>
    %79 = arith.addf %78, %77 : vector<8x128xf32>
    %80 = arith.divf %78, %79 : vector<8x128xf32>
    %81 = arith.mulf %75, %80 : vector<8x128xf32>
    %82 = vector.extract_strided_slice %74 {offsets = [0, 128], sizes = [8, 128], strides = [1, 1]} : vector<8x256xf32> to vector<8x128xf32>
    %83 = arith.mulf %81, %82 : vector<8x128xf32>
    %84 = arith.truncf %83 : vector<8x128xf32> to vector<8x128xbf16>
    %c0_29 = arith.constant 0 : index
    %c0_30 = arith.constant 0 : index
    %85 = vector.load %arg8[%c0_29, %c0_30] : memref<128x32xbf16, #tpu.memory_space<vmem>>, vector<128x32xbf16>
    %cst_31 = arith.constant dense<0.000000e+00> : vector<8x32xf32>
    %86 = tpu.matmul %84, %85, %cst_31 {dimension_numbers = #tpu.dot_dimension_numbers<[1], [0], [0], [1], [0, 0, 1, 1], [], []>} : vector<8x128xbf16>, vector<128x32xbf16>, vector<8x32xf32> -> vector<8x32xf32>
    %87 = arith.addf %61, %86 : vector<8x32xf32>
    %c0_32 = arith.constant 0 : index
    %c0_33 = arith.constant 0 : index
    %88 = vector.load %arg9[%c0_32, %c0_33] : memref<8x32xf32, #tpu.memory_space<vmem>>, vector<8x32xf32>
    tpu.vector_store %arg9[%c0_32, %c0_33], %87 {strides = array<i32>} : memref<8x32xf32, #tpu.memory_space<vmem>>, vector<8x32xf32>,
    return
  }
  func.func @transform_0(%arg0: i32) -> (i32, i32) {
    %c0_i32 = arith.constant 0 : i32
    %c0_i32_0 = arith.constant 0 : i32
    return %arg0, %c0_i32 : i32, i32
  }
  func.func @transform_1(%arg0: i32) -> (i32, i32) {
    %c0_i32 = arith.constant 0 : i32
    %c0_i32_0 = arith.constant 0 : i32
    %c0_i32_1 = arith.constant 0 : i32
    return %c0_i32, %c0_i32_0 : i32, i32
  }
  func.func @transform_2(%arg0: i32) -> (i32, i32) {
    %c0_i32 = arith.constant 0 : i32
    %c0_i32_0 = arith.constant 0 : i32
    %c0_i32_1 = arith.constant 0 : i32
    return %c0_i32, %c0_i32_0 : i32, i32
  }
  func.func @transform_3(%arg0: i32) -> (i32, i32) {
    %c0_i32 = arith.constant 0 : i32
    %c0_i32_0 = arith.constant 0 : i32
    %c0_i32_1 = arith.constant 0 : i32
    return %c0_i32, %c0_i32_0 : i32, i32
  }
  func.func @transform_4(%arg0: i32) -> (i32, i32) {
    %c0_i32 = arith.constant 0 : i32
    %c0_i32_0 = arith.constant 0 : i32
    %c0_i32_1 = arith.constant 0 : i32
    return %c0_i32, %c0_i32_0 : i32, i32
  }
  func.func @transform_5(%arg0: i32) -> (i32, i32) {
    %c0_i32 = arith.constant 0 : i32
    %c0_i32_0 = arith.constant 0 : i32
    %c0_i32_1 = arith.constant 0 : i32
    return %c0_i32, %c0_i32_0 : i32, i32
  }
  func.func @transform_6(%arg0: i32) -> (i32, i32) {
    %c0_i32 = arith.constant 0 : i32
    %c0_i32_0 = arith.constant 0 : i32
    %c0_i32_1 = arith.constant 0 : i32
    return %c0_i32, %c0_i32_0 : i32, i32
  }
  func.func @transform_7(%arg0: i32) -> (i32, i32) {
    %c0_i32 = arith.constant 0 : i32
    %c0_i32_0 = arith.constant 0 : i32
    %c0_i32_1 = arith.constant 0 : i32
    return %c0_i32, %c0_i32_0 : i32, i32
  }
  func.func @transform_8(%arg0: i32) -> (i32, i32) {
    %c0_i32 = arith.constant 0 : i32
    %c0_i32_0 = arith.constant 0 : i32
    return %arg0, %c0_i32 : i32, i32
  }
}

</mosaic_0001>

<bundles_post_ra>
// kernel: fwd.1
= control target key start
LH: loop header
LB: loop body
LE: loop exit
PB: predicated region body
PF: predicated region fallthrough
CT: control target
= control target key end

     0   :  { %13 = vsyncpa [#allocation3], 0  ;;  %s3075_s0 = inlined_call_operand.vmem [shape: f32[16,32], index: 0, kind: input, shape index: {}]   ;;  %s3076_s1 = inlined_call_operand.vmem [shape: bf16[8,256], index: 1, kind: input, shape index: {}]   ;;  %s3077_s2 = inlined_call_operand.vmem [shape: bf16[8,256], index: 2, kind: input, shape index: {}]   ;;  %s3078_s3 = inlined_call_operand.vmem [shape: bf16[32,768], index: 3, kind: input, shape index: {}]   ;;  %s3079_s4 = inlined_call_operand.vmem [shape: bf16[256,96], index: 4, kind: input, shape index: {}]   ;;  %s3080_s5 = inlined_call_operand.vmem [shape: bf16[32,32], index: 5, kind: input, shape index: {}]   ;;  %s3081_s6 = inlined_call_operand.vmem [shape: bf16[32,256], index: 6, kind: input, shape index: {}]   ;;  %s3082_s7 = inlined_call_operand.vmem [shape: bf16[128,32], index: 7, kind: input, shape index: {}]   ;;  %s3083_s8 = inlined_call_operand.hbm [shape: f32[16,32], index: 8, kind: output, shape index: {}]  }
   0x1   :  { %15 = vsyncpa [#allocation3 + $0x1], 0  ;;  %s2737_s27 = smov 0   ;;  %s2739_s28 = smov 0  }
   0x2   :  { %s2741_s29 = smov 0   ;;  %s2743_s30 = smov 0  }
   0x3 LB: > { %s2758_s9 = sadd.s32 4294967295, %s2676_s30   ;;  %s2206_s10 = sadd.s32 4294967294, %s2676_s30   ;;  %s2676_s30 = sphi %s2743_s30, %s3089_s30   ;;  %s2672_s29 = sphi %s2741_s29, %s3088_s29   ;;  %s2668_s28 = sphi %s2739_s28, %s3087_s28   ;;  %s2664_s27 = sphi %s2737_s27, %s3086_s27  }
   0x4   : > { %s2762_s11 = sadd.s32 1, %s2676_s30   ;;  %s201_s12 = sadd.s32 1, %s2672_s29 }
   0x5   : > { %s198_s13 = ssub.s32 %s2676_s30, %s2762_s11  ;;  %p211_p0 = scmp.ne.s32.totalorder %s2672_s29, %s2668_s28 }
   0x6   : > { %p199_p1 = scmp.eq.s32.totalorder %s198_s13, 0  ;;  %p212_p2 = scmp.eq.s32.totalorder %s2758_s9, 1 }
   0x7   : > { %p217_p3 = scmp.ne.s32.totalorder %s2668_s28, %s2664_s27  ;;  %p218_p4 = scmp.eq.s32.totalorder %s2206_s10, 1 }
   0x8   : > { %s2773_s14 = scalar_select %p199_p1, %s2672_s29, %s201_s12  }
   0x9   : > { %p2775_p5 = por %p212_p2, %p211_p0  ;;  %p2779_p6 = por %p218_p4, %p217_p3 }
   0xa   : > { %p2209_p7 = scmp.ge.s32.totalorder %s2676_s30, 1  ;;  %p264_p8 = scmp.lt.s32.totalorder %s2676_s30, 3 }
   0xc   : > { %p265_p9 = pnand %p2209_p7, %p264_p8 }
   0xd   : > { %p297_p10 = scmp.lt.s32.totalorder (!%p265_p9), %s2758_s9, 1  ;;  %vm304_vm0 = vcmask (!%p265_p9), 261120   ;;  %v2556_v3 = vld [vmem:[%s3078_s3 + $0x4] ss:$24 sps:$4 sm:$0xff] (!%p265_p9)   ;;  %v2558_v4 = vld [vmem:[%s3078_s3] ss:$24 sps:$4 sm:$0xff] (!%p265_p9)  }
   0xe   : > { %268 = sbr.rel (%p265_p9) target bundleno = 2915 (0xb63), region = 52  ;;  %v2559_v5 = vld [vmem:[%s3078_s3 + $0x34] ss:$24 sps:$4 sm:$0xff] (!%p265_p9)   ;;  %389 = vmatprep.subr.bf16.mxu0 (!%p265_p9), %v2556_v3  ;;  %v2678_v6 = vmov (!%p265_p9), 0   ;;  %v2561_v7 = vld [vmem:[%s3078_s3 + $0x30] ss:$24 sps:$4 sm:$0xff] (!%p265_p9)  }
   0xf   : > { %421 = vmatprep.mubr.bf16.mxu0 (!%p265_p9), %v2678_v6  ;;  %390 = vmatpush1.bf16.msra.mxu0 (!%p265_p9), %v2558_v4  ;;  %v2564_v8 = vld [vmem:[%s3078_s3 + $0xc] ss:$24 sps:$4 sm:$0xff] (!%p265_p9)   ;;  %v2562_v18 = vld [vmem:[%s3078_s3 + $0x8] ss:$24 sps:$4 sm:$0xff] (!%p265_p9)   ;;  %v2567_v20 = vld [vmem:[%s3078_s3 + $0x3c] ss:$24 sps:$4 sm:$0xff] (!%p265_p9)  }
  0x10   : > { %391 = vmatprep.subr.bf16.mxu0 (!%p265_p9), %v2559_v5  ;;  %v2333_v9 = vld [vmem:[%s3079_s4 + $0x40] sm:$0xff] (!%p265_p9)   ;;  %v2334_v11 = vld [vmem:[%s3079_s4 + $0x48] sm:$0xff] (!%p265_p9)   ;;  %v2565_v21 = vld [vmem:[%s3078_s3 + $0x38] ss:$24 sps:$4 sm:$0xff] (!%p265_p9)   ;;  %s2681_s19 = smov (!%p265_p9), 104   ;;  %s2682_s20 = smov (!%p265_p9), 96  }
  0x11   : > { %v2263_v10 = vld [vmem:[%s3079_s4] sm:$0xff] (!%p265_p9)   ;;  %2473 = vmatprep.subr.bf16.mxu1 (!%p265_p9), %v2333_v9  ;;  %v2326_v12 = vld [vmem:[%s3079_s4 + $0x8] sm:$0xff] (!%p265_p9)   ;;  %v2335_v26 = vld [vmem:[%s3079_s4 + $0x50] sm:$0xff] (!%p265_p9)   ;;  %v2683_v4 = vmov (!%p265_p9), 0.0   ;;  %vm2684_vm1 = vmmov (!%p265_p9), 0   ;;  %vm807_vm2 = vcmask (!%p265_p9), 64512  }
  0x12   : > { %2475 = vmatpush3.bf16.msra.mxu1 (!%p265_p9), %v2263_v10  ;;  %v2570_v22 = vld [vmem:[%s3078_s3 + $0x14] ss:$24 sps:$4 sm:$0xff] (!%p265_p9)   ;;  %v2568_v23 = vld [vmem:[%s3078_s3 + $0x10] ss:$24 sps:$4 sm:$0xff] (!%p265_p9)   ;;  %v2573_v24 = vld [vmem:[%s3078_s3 + $0x44] ss:$24 sps:$4 sm:$0xff] (!%p265_p9)  }
  0x13   : > { %392 = vmatpush1.bf16.msra.mxu0 (!%p265_p9), %v2561_v7  ;;  %2477 = vmatprep.subr.bf16.mxu1 (!%p265_p9), %v2334_v11  ;;  %v2571_v25 = vld [vmem:[%s3078_s3 + $0x40] ss:$24 sps:$4 sm:$0xff] (!%p265_p9)   ;;  %v2327_v27 = vld [vmem:[%s3079_s4 + $0x10] sm:$0xff] (!%p265_p9)   ;;  %v2338_v32 = vld [vmem:[%s3079_s4 + $0x68] sm:$0xff] (!%p265_p9)   ;;  %s2688_s26 = smov (!%p265_p9), 8   ;;  %s2689_s10 = smov (!%p265_p9), 16  }
  0x14   : > { %430 = vmatprep.subr.bf16.mxu0 (!%p265_p9), %v2564_v8  ;;  %v2336_v28 = vld [vmem:[%s3079_s4 + $0x58] sm:$0xff] (!%p265_p9)   ;;  %v2337_v30 = vld [vmem:[%s3079_s4 + $0x60] sm:$0xff] (!%p265_p9)   ;;  %v2330_v33 = vld [vmem:[%s3079_s4 + $0x28] sm:$0xff] (!%p265_p9)   ;;  %s2690_s12 = smov (!%p265_p9), 24   ;;  %vm1876_vm4 = vcmask (!%p265_p9), 130048   ;;  %vm1878_vm5 = vcmask (!%p265_p9), 195584  }
  0x15   : > { %s298_s17 = scalar_select %p297_p10, %s2758_s9, 1  ;;  %v2328_v29 = vld [vmem:[%s3079_s4 + $0x18] sm:$0xff]   ;;  %v2329_v31 = vld [vmem:[%s3079_s4 + $0x20] sm:$0xff]   ;;  %v2339_v34 = vld [vmem:[%s3079_s4 + $0x70] sm:$0xff]  }
  0x16   : > { %2479 = vmatpush3.bf16.msra.mxu1 %v2326_v12  ;;  %v2331_v35 = vld [vmem:[%s3079_s4 + $0x30] sm:$0xff]   ;;  %v2340_v36 = vld [vmem:[%s3079_s4 + $0x78] sm:$0xff]   ;;  %v512_v44 = vld [vmem:[%s3076_s1] sm:$0xff]  ;;  %s2259_s13 = sshll.u32 %s2758_s9, 7  ;;  %s2691_s23 = smov [#allocation2]  }
  0x17   : > { %s2211_s18 = sshll.u32 %s298_s17, 3  ;;  %2481 = vmatprep.subr.bf16.mxu1 %v2335_v26  ;;  %v2332_v37 = vld [vmem:[%s3079_s4 + $0x38] sm:$0xff]   ;;  %v517_v46 = vld [vmem:[%s3077_s2] sm:$0xff]  ;;  %v513_v48 = vunpack.c.l.bf16 %v512_v44  ;;  %v514_v50 = vunpack.c.h.bf16 %v512_v44  ;;  %s2679_s17 = smov 112  }
  0x18   : > { %s300_s21 = scalar_lea.vmem %s3075_s0, %s2211_s18  ;;  %v518_v49 = vunpack.c.l.bf16 %v517_v46  ;;  %v519_v51 = vunpack.c.h.bf16 %v517_v46  ;;  %s2680_s18 = smov 120  }
  0x19   : > { %v2790_v0 = vld [vmem:[%s300_s21] sm:$0xff]  ;;  %s2685_s21 = smov 64   ;;  %s2618_s24 = sshll.u32 %s2691_s23, 4  ;;  %s2619_s24 = int_to_ptr.vmem [resolvable:$false] %s2618_s24 }
  0x1a   : > { %v303_v1 = vmul.f32 %v2790_v0, %v2790_v0  ;;  %2483 = vmatpush3.bf16.msra.mxu1 %v2327_v27  ;;  %s2620_s25 = scalar_lea.vmem %s2619_s24, 256 }
  0x1b   : > { %2485 = vmatprep.subr.bf16.mxu1 %v2336_v28 }
  0x1c   : > { %v305_v2 = vsel %vm304_vm0, %v303_v1, 0.0 }
  0x1d   : > { %306 = vadd.xlane.f32.xlu0 %v305_v2 }
  0x1e   : > { %2487 = vmatpush3.bf16.msra.mxu1 %v2328_v29 }
  0x1f   : > { %2489 = vmatprep.subr.bf16.mxu1 %v2337_v30 }
  0x22   : > { %2491 = vmatpush3.bf16.msra.mxu1 %v2329_v31 }
  0x23   : > { %2493 = vmatprep.subr.bf16.mxu1 %v2338_v32 }
  0x26   : > { %2495 = vmatpush3.bf16.msra.mxu1 %v2330_v33 }
  0x27   : > { %2497 = vmatprep.subr.bf16.mxu1 %v2339_v34 }
  0x2a   : > { %2499 = vmatpush3.bf16.msra.mxu1 %v2331_v35 }
  0x2b   : > { %2501 = vmatprep.subr.bf16.mxu1 %v2340_v36 }
  0x2e   : > { %2503 = vmatpush3.bf16.msra.mxu1 %v2332_v37 }
  0x2f   : > { %2444 = vmatprep.subr.bf16.mxu1 %v2683_v4 }
  0xaa   : > { %v307_v13 = vpop.xlane.xlu0 %306 }
  0xab   : > { %v309_v14 = vmul.f32 0.03125, %v307_v13 }
  0xad   : > { %v310_v15 = vadd.f32 1.1920929e-07, %v309_v14 }
  0xaf   : > { %2590 = vrsqrt.f32 %v310_v15 }
  0xb9   : > { %v2591_v16 = vpop.eup %2590 }
  0xba   : > { %v312_v17 = vmul.f32 %v2591_v16, %v2790_v0 }
  0xbc   : > { %v313_v19 = vpack.c.bf16 %v312_v17, %v312_v17  ;;  %v1100_v17 = vlaneseq }
  0xbe   : > { %2224 = vmatmul.mubr.msk.bf16.vlgmr.msra.gmra.mrb[0].mxu0 %vm304_vm0, %v313_v19 }
  0xbf   : > { %431 = vmatpush1.bf16.msra.mxu0 %v2562_v18  ;;  %462 = vmatprep.mubr.bf16.mxu0 %v2678_v6  ;;  %v2922_v18 = vshrl.u32 %v1100_v17, 7 }
  0xc0   : > { %432 = vmatprep.subr.bf16.mxu0 %v2567_v20 }
  0xc3   : > { %433 = vmatpush1.bf16.msra.mxu0 %v2565_v21 }
  0xc4   : > { %471 = vmatprep.subr.bf16.mxu0 %v2570_v22 }
  0xc6   : > { %2225 = vmatmul.mubr.msk.bf16.vlgmr.msra.gmra.mrb[4].mxu0 %vm304_vm0, %v313_v19 }
  0xc7   : > { %472 = vmatpush1.bf16.msra.mxu0 %v2568_v23  ;;  %503 = vmatprep.mubr.bf16.mxu0 %v2678_v6 }
  0xc8   : > { %473 = vmatprep.subr.bf16.mxu0 %v2573_v24 }
  0xcb   : > { %474 = vmatpush1.bf16.msra.mxu0 %v2571_v25 }
  0xcc   : > { %2404 = vmatprep.subr.mxu0 %v2683_v4 }
  0xce   : > { %2226 = vmatmul.mubr.msk.bf16.vlgmr.msra.gmra.mrb[8].mxu0 %vm304_vm0, %v313_v19  ;;  %v1103_v19 = vand.u32 127, %v1100_v17 }
  0xcf   : > { %2406 = vmatprep.mubr.msk.f32.mxu0 %vm2684_vm1, %v2683_v4 }
  0xd0   : > { %vm1104_vm3 = vcmp.le.s32.totalorder %v1103_v19, %v2922_v18 }
 0x191   : > { %v423_v38 = vpop.f32.mrb[0].mxu0 }
 0x192   : > { %v425_v39 = vpop.f32.mrb[1].mxu0 }
 0x193   : > { %v427_v40 = vpop.f32.mrb[2].mxu0 }
 0x194   : > { %v428_v41 = vpop.f32.mrb[3].mxu0 }
 0x199   : > { %v464_v42 = vpop.f32.mrb[4].mxu0 }
 0x19a   : > { %v466_v43 = vpop.f32.mrb[5].mxu0  ;;  %v515_v53 = vmul.f32 %v513_v48, %v464_v42 }
 0x19b   : > { %v468_v45 = vpop.f32.mrb[6].mxu0  ;;  %v516_v56 = vmul.f32 %v514_v50, %v466_v43 }
 0x19c   : > { %v469_v47 = vpop.f32.mrb[7].mxu0 }
 0x1a1   : > { %v505_v52 = vpop.f32.mrb[8].mxu0 }
 0x1a2   : > { %v520_v54 = vmul.f32 %v518_v49, %v505_v52  ;;  %v507_v55 = vpop.f32.mrb[9].mxu0 }
 0x1a3   : > { %v521_v57 = vmul.f32 %v519_v51, %v507_v55  ;;  %v509_v58 = vpop.f32.mrb[10].mxu0 }
 0x1a4   : > { %v522_v59 = vadd.f32 %v520_v54, %v515_v53  ;;  %v510_v60 = vpop.f32.mrb[11].mxu0 }
 0x1a5   : > { %v523_v61 = vadd.f32 %v521_v57, %v516_v56 }
 0x1a6   : > { %v524_v62 = vmul.f32 %v522_v59, %v423_v38 }
 0x1a7   : > { %v525_v63 = vmul.f32 %v523_v61, %v425_v39 }
 0x1a9   : > { %654 = vmatprep.mubr.f32.mxu1 %v525_v63 }
 0x1aa   : > { %655 = vmatmul.mubr.f32.vlgmr.msra.gmra.mrb[0].mxu1 %v524_v62 }
 0x1ab   : > { %2448 = vmatprep.mubr.msk.bf16.mxu1 %vm2684_vm1, %v2683_v4 }
 0x27d   : > { %v2373_v1 = vpop.f32.mrb[0].mxu1 }
 0x27e   : > { %v2374_v2 = vpop.f32.mrb[1].mxu1 }
 0x27f   : > { %v2375_v3 = vadd.f32 %v2374_v2, %v2373_v1 }
 0x281   : > { %663 = vrot.lane.b32.xlu1 %v2375_v3, %s2679_s17  ;;  %661 = vrot.lane.b32.xlu0 %v2375_v3, %s2680_s18 }
 0x285   : > { %665 = vrot.lane.b32.xlu1 %v2375_v3, %s2681_s19 }
 0x289   : > { %667 = vrot.lane.b32.xlu1 %v2375_v3, %s2682_s20 }
 0x2f3   : > { %v2894_v5 = vpop.permute.xlu0 %661  ;;  %v664_v7 = vpop.permute.xlu1 %663 }
 0x2f4   : > { %669 = vrot.lane.b32.xlu1 %v2894_v5, %s2682_s20 }
 0x2f7   : > { %v2897_v8 = vpop.permute.xlu1 %665 }
 0x2f8   : > { %671 = vrot.lane.b32.xlu1 %v664_v7, %s2682_s20 }
 0x2fb   : > { %v668_v9 = vpop.permute.xlu1 %667 }
 0x2fc   : > { %673 = vrot.lane.b32.xlu1 %v2897_v8, %s2682_s20 }
 0x325   : > { %679 = vxpose.xlu1.b32.start.end [1/1] (short) (narrow) %v668_v9, 8 }
 0x366   : > { %v670_v10 = vpop.permute.xlu1 %669 }
 0x367   : > { %711 = vxpose.xlu0.b32.start.end [1/1] (short) (narrow) %v670_v10, 8 }
 0x36a   : > { %v672_v11 = vpop.permute.xlu1 %671 }
 0x36b   : > { %743 = vxpose.xlu0.b32.start.end [1/1] (short) (narrow) %v672_v11, 8 }
 0x36e   : > { %v674_v12 = vpop.permute.xlu1 %673 }
 0x36f   : > { %775 = vxpose.xlu0.b32.start.end [1/1] (short) (narrow) %v674_v12, 8 }
 0x3a5   : > { %v695_v13 = vpop.trf.xlu1 }
 0x3a6   : > { %2405 = vmatpush3.msra.mxu0 %v695_v13 }
 0x3a7   : > { %2407 = vmatmul.mubr.msk.f32.vlgmr.msra.gmra.mrb[12].mxu0 %vm807_vm2, %v2375_v3  ;;  %2409 = vmatprep.subr.mxu0 %v2683_v4 }
 0x3a8   : > { %2411 = vmatprep.mubr.msk.f32.mxu0 %vm2684_vm1, %v2683_v4 }
 0x3e7   : > { %v727_v14 = vpop.trf.xlu0 }
 0x3e8   : > { %2410 = vmatpush3.msra.mxu0 %v727_v14 }
 0x3e9   : > { %2412 = vmatmul.mubr.msk.f32.vlgmr.msra.gmra.mrb[14].mxu0 %vm807_vm2, %v2894_v5  ;;  %2414 = vmatprep.subr.mxu0 %v2683_v4 }
 0x3ea   : > { %2416 = vmatprep.mubr.msk.f32.mxu0 %vm2684_vm1, %v2683_v4 }
 0x3eb   : > { %v759_v15 = vpop.trf.xlu0 }
 0x3ec   : > { %2415 = vmatpush3.msra.mxu0 %v759_v15 }
 0x3ed   : > { %2417 = vmatmul.mubr.msk.f32.vlgmr.msra.gmra.mrb[16].mxu0 %vm807_vm2, %v664_v7  ;;  %2419 = vmatprep.subr.mxu0 %v2683_v4 }
 0x3ee   : > { %2421 = vmatprep.mubr.msk.f32.mxu0 %vm2684_vm1, %v2683_v4 }
 0x3ef   : > { %v791_v16 = vpop.trf.xlu0 }
 0x3f0   : > { %2420 = vmatpush3.msra.mxu0 %v791_v16 }
 0x3f1   : > { %2422 = vmatmul.mubr.msk.f32.vlgmr.msra.gmra.mrb[18].mxu0 %vm807_vm2, %v2897_v8  ;;  %2424 = vmatprep.subr.mxu0 %v2683_v4 }
 0x3f2   : > { %2426 = vmatprep.mubr.msk.f32.mxu0 %vm2684_vm1, %v2683_v4 }
 0x47a   : > { %v876_v20 = vpop.f32.mrb[12].mxu0 }
 0x47b   : > { %v1096_v21 = vmul.f32 0.35355338, %v876_v20  ;;  %v2408_v22 = vpop.f32.mrb[13].mxu0 }
 0x47d   : > { %v1107_v23 = vsel %vm1104_vm3, %v1096_v21, -1e+30 }
 0x47e   : > { %v1111_v24 = vsel %vm807_vm2, %v1107_v23, -inf }
 0x47f   : > { %1112 = vmax.xlane.f32.xlu0 %v1111_v24 }
 0x495   : > { %1155 = vrot.lane.b32.xlu0 %v2375_v3, %s2685_s21 }
 0x499   : > { %1159 = vrot.lane.b32.xlu0 %v664_v7, %s2685_s21 }
 0x4bc   : > { %v948_v25 = vpop.f32.mrb[14].mxu0 }
 0x4bd   : > { %v1097_v26 = vmul.f32 0.35355338, %v948_v25  ;;  %v2413_v27 = vpop.f32.mrb[15].mxu0 }
 0x4bf   : > { %v1108_v28 = vsel %vm1104_vm3, %v1097_v26, -1e+30 }
 0x4c0   : > { %v1020_v29 = vpop.f32.mrb[16].mxu0  ;;  %v1114_v30 = vsel %vm807_vm2, %v1108_v28, -inf }
 0x4c1   : > { %v1098_v31 = vmul.f32 0.35355338, %v1020_v29  ;;  %1115 = vmax.xlane.f32.xlu1 %v1114_v30  ;;  %v2418_v32 = vpop.f32.mrb[17].mxu0  ;;  %v2686_v29 = vmov 1983009808  }
 0x4c2   : > { %v1730_v30 = vunpack.c.l.s4 %v2686_v29 }
 0x4c3   : > { %v1109_v33 = vsel %vm1104_vm3, %v1098_v31, -1e+30  ;;  %v2687_v31 = vmov 1934713408  }
 0x4c4   : > { %v1092_v34 = vpop.f32.mrb[18].mxu0  ;;  %v1117_v35 = vsel %vm807_vm2, %v1109_v33, -inf  ;;  %v1762_v32 = vunpack.c.l.s4 %v2687_v31  ;;  %v2576_v31 = vld [vmem:[%s3081_s6] ss:$8 sps:$4 sm:$0xff]  }
 0x4c5   : > { %v1099_v36 = vmul.f32 0.35355338, %v1092_v34  ;;  %1118 = vmax.xlane.f32.xlu1 %v1117_v35  ;;  %v2423_v37 = vpop.f32.mrb[19].mxu0  ;;  %v1731_v34 = vunpack.c.0.s8 %v1730_v30  ;;  %v2578_v30 = vld [vmem:[%s3081_s6 + $0x4] ss:$8 sps:$4 sm:$0xff]  }
 0x4c6   : > { %v1763_v35 = vunpack.c.0.s8 %v1762_v32  ;;  %v2579_v32 = vld [vmem:[%s3081_s6 + $0x10] ss:$8 sps:$4 sm:$0xff]  }
 0x4c7   : > { %v1110_v38 = vsel %vm1104_vm3, %v1099_v36, -1e+30  ;;  %v1734_v36 = vsub.s32 %v1731_v34, %v2922_v18 }
 0x4c8   : > { %v1120_v39 = vsel %vm807_vm2, %v1110_v38, -inf }
 0x4c9   : > { %1121 = vmax.xlane.f32.xlu1 %v1120_v39 }
 0x4da   : > { %1157 = vrot.lane.b32.xlu1 %v2894_v5, %s2685_s21 }
 0x50c   : > { %v1113_v40 = vpop.xlane.xlu0 %1112 }
 0x50d   : > { %v1123_v41 = vsub.f32 %v1107_v23, %v1113_v40 }
 0x50f   : > { %v1127_v42 = vmul.f32 1.442695, %v1123_v41 }
 0x510   : > { %v1156_v61 = vpop.permute.xlu0 %1155 }
 0x511   : > { %2592 = vpow2.f32 %v1127_v42  ;;  %v1766_v42 = vsub.s32 %v1763_v35, %v2922_v18 }
 0x514   : > { %v1160_v62 = vpop.permute.xlu0 %1159 }
 0x51b   : > { %v2593_v43 = vpop.eup %2592 }
 0x51c   : > { %v1135_v44 = vsel %vm807_vm2, %v2593_v43, 0.0 }
 0x51d   : > { %1136 = vadd.xlane.f32.xlu1 %v1135_v44 }
 0x52e   : > { %1161 = vrot.lane.b32.xlu1 %v2897_v8, %s2685_s21  ;;  %s3032_s21 = scalar_lea.hbm %s3083_s8, %s2259_s13 }
 0x54e   : > { %v1116_v45 = vpop.xlane.xlu1 %1115 }
 0x54f   : > { %v1124_v46 = vsub.f32 %v1108_v28, %v1116_v45 }
 0x551   : > { %v1129_v47 = vmul.f32 1.442695, %v1124_v46 }
 0x552   : > { %v1119_v48 = vpop.xlane.xlu1 %1118 }
 0x553   : > { %2594 = vpow2.f32 %v1129_v47  ;;  %v1125_v49 = vsub.f32 %v1109_v33, %v1119_v48 }
 0x555   : > { %v1131_v50 = vmul.f32 1.442695, %v1125_v49 }
 0x556   : > { %v1122_v51 = vpop.xlane.xlu1 %1121 }
 0x557   : > { %2596 = vpow2.f32 %v1131_v50  ;;  %v1126_v52 = vsub.f32 %v1110_v38, %v1122_v51  ;;  %v2574_v51 = vld [vmem:[%s3080_s5] sm:$0xff]  }
 0x558   : > { %2445 = vmatpush3.bf16.msra.mxu1 %v2574_v51 }
 0x559   : > { %v1133_v53 = vmul.f32 1.442695, %v1126_v52  ;;  %2446 = vmatprep.subr.bf16.mxu1 %v2683_v4 }
 0x55a   : > { %v1158_v54 = vpop.permute.xlu1 %1157 }
 0x55b   : > { %2598 = vpow2.f32 %v1133_v53  ;;  %1199 = vxpose.xlu1.b32.start.end [1/1] (short) (narrow) %v1158_v54, 8 }
 0x55d   : > { %v2595_v55 = vpop.eup %2594 }
 0x55e   : > { %v1138_v56 = vsel %vm807_vm2, %v2595_v55, 0.0 }
 0x55f   : > { %1139 = vadd.xlane.f32.xlu0 %v1138_v56 }
 0x561   : > { %v2597_v57 = vpop.eup %2596 }
 0x562   : > { %v1141_v58 = vsel %vm807_vm2, %v2597_v57, 0.0 }
 0x563   : > { %1142 = vadd.xlane.f32.xlu0 %v1141_v58 }
 0x565   : > { %v2599_v59 = vpop.eup %2598 }
 0x566   : > { %v1144_v60 = vsel %vm807_vm2, %v2599_v59, 0.0 }
 0x567   : > { %1145 = vadd.xlane.f32.xlu0 %v1144_v60 }
 0x594   : > { %1167 = vxpose.xlu0.b32.start.end [1/1] (short) (narrow) %v1156_v61, 8 }
 0x598   : > { %1231 = vxpose.xlu0.b32.start.end [1/1] (short) (narrow) %v1160_v62, 8 }
 0x5aa   : > { %v1137_v63 = vpop.xlane.xlu1 %1136 }
 0x5ab   : > { %2600 = vrcp.f32 %v1137_v63 }
 0x5ae   : > { %v1162_v1 = vpop.permute.xlu1 %1161 }
 0x5af   : > { %1263 = vxpose.xlu0.b32.start.end [1/1] (short) (narrow) %v1162_v1, 8 }
 0x5b5   : > { %v2601_v2 = vpop.eup %2600 }
 0x5b6   : > { %v1151_v3 = vmul.f32 %v2601_v2, %v2593_v43 }
 0x5b8   : > { %2425 = vmatpush3.xpose.msk.msra.mxu0 %vm807_vm2, %v1151_v3 }
 0x5b9   : > { %2429 = vmatprep.subr.mxu0 %v2683_v4 }
 0x5db   : > { %v1215_v13 = vpop.trf.xlu1 }
 0x5ec   : > { %v1140_v5 = vpop.xlane.xlu0 %1139 }
 0x5ed   : > { %2602 = vrcp.f32 %v1140_v5 }
 0x5f0   : > { %v1143_v7 = vpop.xlane.xlu0 %1142 }
 0x5f1   : > { %2604 = vrcp.f32 %v1143_v7 }
 0x5f4   : > { %v1146_v8 = vpop.xlane.xlu0 %1145 }
 0x5f5   : > { %2606 = vrcp.f32 %v1146_v8 }
 0x5f7   : > { %v2603_v9 = vpop.eup %2602 }
 0x5f8   : > { %v1152_v10 = vmul.f32 %v2603_v9, %v2595_v55 }
 0x5fb   : > { %v2605_v12 = vpop.eup %2604 }
 0x5fc   : > { %v1153_v14 = vmul.f32 %v2605_v12, %v2597_v57 }
 0x5ff   : > { %v2607_v15 = vpop.eup %2606 }
 0x600   : > { %v1154_v17 = vmul.f32 %v2607_v15, %v2599_v59  ;;  %v2575_v59 = vld [vmem:[%s3080_s5 + $0x8] sm:$0xff]  }
 0x601   : > { %2447 = vmatpush3.bf16.msra.mxu1 %v2575_v59 }
 0x602   : > { %2452 = vmatprep.subr.bf16.mxu1 %v2683_v4 }
 0x614   : > { %v1183_v11 = vpop.trf.xlu0 }
 0x615   : > { %2427 = vmatmul.mubr.msk.f32.vlgmr.msra.gmra.mrb[20].mxu0 %vm807_vm2, %v1183_v11 }
 0x616   : > { %2430 = vmatpush3.xpose.msk.msra.mxu0 %vm807_vm2, %v1152_v10  ;;  %2431 = vmatprep.mubr.msk.f32.mxu0 %vm2684_vm1, %v2683_v4 }
 0x617   : > { %2434 = vmatprep.subr.mxu0 %v2683_v4 }
 0x618   : > { %v1247_v16 = vpop.trf.xlu0 }
 0x619   : > { %2432 = vmatmul.mubr.msk.f32.vlgmr.msra.gmra.mrb[22].mxu0 %vm807_vm2, %v1215_v13 }
 0x61a   : > { %2435 = vmatpush3.xpose.msk.msra.mxu0 %vm807_vm2, %v1153_v14  ;;  %2436 = vmatprep.mubr.msk.f32.mxu0 %vm2684_vm1, %v2683_v4 }
 0x61b   : > { %2439 = vmatprep.subr.mxu0 %v2683_v4 }
 0x61d   : > { %2437 = vmatmul.mubr.msk.f32.vlgmr.msra.gmra.mrb[24].mxu0 %vm807_vm2, %v1247_v16 }
 0x61e   : > { %2440 = vmatpush3.xpose.msk.msra.mxu0 %vm807_vm2, %v1154_v17  ;;  %2441 = vmatprep.mubr.msk.f32.mxu0 %vm2684_vm1, %v2683_v4 }
 0x61f   : > { %1977 = vmatprep.subr.bf16.mxu0 %v2578_v30 }
 0x62f   : > { %v1279_v19 = vpop.trf.xlu0 }
 0x630   : > { %2442 = vmatmul.mubr.msk.f32.vlgmr.msra.gmra.mrb[26].mxu0 %vm807_vm2, %v1279_v19 }
 0x631   : > { %2009 = vmatprep.mubr.bf16.mxu0 %v2678_v6  ;;  %1978 = vmatpush1.bf16.msra.mxu0 %v2576_v31 }
 0x6e8   : > { %v1367_v20 = vpop.f32.mrb[20].mxu0 }
 0x6e9   : > { %v2428_v21 = vpop.f32.mrb[21].mxu0  ;;  %1599 = vxpose.xlu1.b32.start.end [1/1] (short) (narrow) %v1367_v20, 8 }
 0x6ec   : > { %v1443_v22 = vpop.f32.mrb[22].mxu0 }
 0x6ed   : > { %1631 = vxpose.xlu0.b32.start.end [1/1] (short) (narrow) %v1443_v22, 8  ;;  %v2433_v23 = vpop.f32.mrb[23].mxu0 }
 0x6f0   : > { %v1519_v24 = vpop.f32.mrb[24].mxu0 }
 0x6f1   : > { %v2438_v25 = vpop.f32.mrb[25].mxu0  ;;  %1663 = vxpose.xlu1.b32.start.end [1/1] (short) (narrow) %v1519_v24, 8 }
 0x703   : > { %v1595_v26 = vpop.f32.mrb[26].mxu0 }
 0x704   : > { %1695 = vxpose.xlu0.b32.start.end [1/1] (short) (narrow) %v1595_v26, 8  ;;  %v2443_v27 = vpop.f32.mrb[27].mxu0 }
 0x769   : > { %v1615_v28 = vpop.trf.xlu1 }
 0x76d   : > { %v1647_v33 = vpop.trf.xlu0 }
 0x771   : > { %v1679_v6 = vpop.trf.xlu1 }
 0x772   : > { %v1727_v37 = vcombine.low %v1615_v28, %v1679_v6  ;;  %v1728_v38 = vcombine.high %v1615_v28, %v1679_v6 }
 0x774   : > { %v1735_v43 = vrot.slane %v1727_v37, %v1734_v36  ;;  %v1742_v44 = vrot.slane %v1728_v38, %v1734_v36  ;;  %v2582_v38 = vld [vmem:[%s3082_s7] sm:$0xff]  }
 0x784   : > { %v1711_v39 = vpop.trf.xlu0 }
 0x785   : > { %v1743_v40 = vcombine.low %v1647_v33, %v1711_v39  ;;  %v1744_v41 = vcombine.high %v1647_v33, %v1711_v39  ;;  %v2583_v39 = vld [vmem:[%s3082_s7 + $0x8] sm:$0xff]  }
 0x787   : > { %v1751_v45 = vrot.slane %v1743_v40, %v1734_v36  ;;  %v1758_v46 = vrot.slane %v1744_v41, %v1734_v36  ;;  %v2584_v40 = vld [vmem:[%s3082_s7 + $0x10] sm:$0xff]   ;;  %v2585_v41 = vld [vmem:[%s3082_s7 + $0x18] sm:$0xff]  }
 0x789   : > { %v1759_v47 = vcombine.low %v1735_v43, %v1751_v45  ;;  %v1760_v48 = vcombine.high %v1735_v43, %v1751_v45  ;;  %v1775_v49 = vcombine.low %v1742_v44, %v1758_v46  ;;  %v1776_v50 = vcombine.high %v1742_v44, %v1758_v46  ;;  %v2587_v43 = vld [vmem:[%s3082_s7 + $0x28] sm:$0xff]   ;;  %v2588_v44 = vld [vmem:[%s3082_s7 + $0x30] sm:$0xff]   ;;  %v2589_v45 = vld [vmem:[%s3082_s7 + $0x38] sm:$0xff]  }
 0x78b   : > { %v1767_v52 = vrot.slane %v1759_v47, %v1766_v42  ;;  %v1774_v53 = vrot.slane %v1760_v48, %v1766_v42  ;;  %v1783_v54 = vrot.slane %v1775_v49, %v1766_v42  ;;  %v1790_v55 = vrot.slane %v1776_v50, %v1766_v42 }
 0x78d   : > { %v1795_v18 = vcombine.low %v1767_v52, %v1774_v53  ;;  %v2239_v56 = vcombine.high %v1767_v52, %v1774_v53  ;;  %v1811_v57 = vcombine.low %v1783_v54, %v1790_v55  ;;  %v2240_v58 = vcombine.high %v1783_v54, %v1790_v55 }
 0x78f   : > { %v1802_v60 = vrot.slane %v1795_v18, %v1734_v36  ;;  %v1810_v61 = vrot.slane %v2239_v56, %v1734_v36  ;;  %v1818_v62 = vrot.slane %v1811_v57, %v1734_v36  ;;  %v1826_v63 = vrot.slane %v2240_v58, %v1734_v36 }
 0x791   : > { %v1827_v1 = vcombine.low %v1802_v60, %v1810_v61  ;;  %v1843_v2 = vcombine.low %v1818_v62, %v1826_v63  ;;  %v1828_v3 = vcombine.high %v1802_v60, %v1810_v61  ;;  %v1844_v5 = vcombine.high %v1818_v62, %v1826_v63 }
 0x793   : > { %v1835_v7 = vrot.slane %v1827_v1, %v1766_v42  ;;  %v1851_v8 = vrot.slane %v1843_v2, %v1766_v42  ;;  %v1842_v9 = vrot.slane %v1828_v3, %v1766_v42  ;;  %v1858_v10 = vrot.slane %v1844_v5, %v1766_v42  ;;  %v2586_v42 = vld [vmem:[%s3082_s7 + $0x20] sm:$0xff]  }
 0x795   : > { %v1860_v11 = vcombine.high %v1835_v7, %v1851_v8  ;;  %v1861_v12 = vcombine.low %v1842_v9, %v1858_v10  ;;  %v1859_v13 = vcombine.low %v1835_v7, %v1851_v8  ;;  %v1862_v14 = vcombine.high %v1842_v9, %v1858_v10 }
 0x797   : > { %1864 = vrot.lane.b32.xlu1 %v1860_v11, %s2688_s26  ;;  %1868 = vrot.lane.b32.xlu0 %v1861_v12, %s2689_s10  ;;  %s294_s10 = sand.u32 1, %s2668_s28  }
 0x798   : > { %s2134_s9 = scalar_lea.sflag [#allocation3], %s294_s10 }
 0x79b   : > { %1872 = vrot.lane.b32.xlu1 %v1862_v14, %s2690_s12  ;;  %s2210_s12 = sshll.u32 %s294_s10, 3 }
 0x79c   : > { %s296_s17 = scalar_lea.vmem [#allocation2], %s2210_s12 }
 0x79d   : > { %s2147_s18 = sshll.u32 %s296_s17, 4  ;;  %s3034_s18 = int_to_ptr.vmem [resolvable:$true] %s2147_s18 }
 0x79e   : > { %s2614_s22 = scalar_lea.vmem %s3034_s18, 128  ;;  %p2621_p0 = scmp.lt.s32.totalorder %s3034_s18, %s2619_s24 }
 0x79f   : > { %p2615_p11 = scmp.ne.s32.totalorder %s3034_s18, %s2614_s22  ;;  %p2622_p1 = scmp.lt.s32.totalorder %s2620_s25, %s2614_s22 }
 0x7a1   : > { %p2616_p12 = pnand %p2615_p11, %p2775_p5  ;;  %p2623_p2 = por %p2622_p1, %p2621_p0 }
 0x7a3   : > { %p2617_p13 = pneg %p2616_p12 }
 0x7a5   : > { %p2624_p3 = pnand %p2623_p2, %p2617_p13 }
 0x809   : > { %v1865_v15 = vpop.permute.xlu1 %1864  ;;  %v1869_v17 = vpop.permute.xlu0 %1868 }
 0x80a   : > { %v1875_v16 = vsel %vm807_vm2, %v1859_v13, %v1865_v15 }
 0x80b   : > { %v1877_v19 = vsel %vm1876_vm4, %v1875_v16, %v1869_v17 }
 0x80d   : > { %v1873_v20 = vpop.permute.xlu1 %1872 }
 0x80e   : > { %v1879_v21 = vsel %vm1878_vm5, %v1877_v19, %v1873_v20 }
 0x80f   : > { %v1880_v22 = vpack.c.bf16 %v1879_v21, %v1879_v21 }
 0x811   : > { %2449 = vmatmul.mubr.msk.bf16.vlgmr.msra.gmra.mrb[4].mxu1 %vm304_vm0, %v1880_v22 }
 0x812   : > { %2468 = vmatprep.mubr.msk.bf16.mxu1 %vm2684_vm1, %v2683_v4  ;;  %2453 = vmatpush3.bf16.msra.mxu1 %v2582_v38 }
 0x813   : > { %2454 = vmatprep.subr.bf16.mxu1 %v2683_v4 }
 0x816   : > { %2455 = vmatpush3.bf16.msra.mxu1 %v2583_v39 }
 0x817   : > { %2456 = vmatprep.subr.bf16.mxu1 %v2683_v4 }
 0x81a   : > { %2457 = vmatpush3.bf16.msra.mxu1 %v2584_v40 }
 0x81b   : > { %2458 = vmatprep.subr.bf16.mxu1 %v2683_v4 }
 0x81e   : > { %2459 = vmatpush3.bf16.msra.mxu1 %v2585_v41 }
 0x81f   : > { %2460 = vmatprep.subr.bf16.mxu1 %v2683_v4 }
 0x822   : > { %2461 = vmatpush3.bf16.msra.mxu1 %v2586_v42 }
 0x823   : > { %2462 = vmatprep.subr.bf16.mxu1 %v2683_v4 }
 0x826   : > { %2463 = vmatpush3.bf16.msra.mxu1 %v2587_v43 }
 0x827   : > { %2464 = vmatprep.subr.bf16.mxu1 %v2683_v4 }
 0x82a   : > { %2465 = vmatpush3.bf16.msra.mxu1 %v2588_v44 }
 0x82b   : > { %2466 = vmatprep.subr.bf16.mxu1 %v2683_v4 }
 0x82e   : > { %2467 = vmatpush3.bf16.msra.mxu1 %v2589_v45 }
 0x8e4   : > { %v1934_v23 = vpop.f32.mrb[4].mxu1 }
 0x8e5   : > { %v2976_v24 = vadd.f32 %v1934_v23, %v2790_v0  ;;  %v2450_v25 = vpop.f32.mrb[5].mxu1  ;;  %v2581_v0 = vld [vmem:[%s3081_s6 + $0x14] ss:$8 sps:$4 sm:$0xff]  }
 0x8e6   : > { %v1937_v26 = vpop.f32.mrb[6].mxu1  ;;  %1979 = vmatprep.subr.bf16.mxu0 %v2581_v0 }
 0x8e7   : > { %v2451_v27 = vpop.f32.mrb[7].mxu1  ;;  %v1941_v28 = vmul.f32 %v2976_v24, %v2976_v24  ;;  %1980 = vmatpush1.bf16.msra.mxu0 %v2579_v32 }
 0x8e9   : > { %v1942_v29 = vsel %vm304_vm0, %v1941_v28, 0.0 }
 0x8ea   : > { %1943 = vadd.xlane.f32.xlu1 %v1942_v29 }
 0x977   : > { %v1944_v33 = vpop.xlane.xlu1 %1943 }
 0x978   : > { %v1945_v34 = vmul.f32 0.03125, %v1944_v33 }
 0x97a   : > { %v1946_v6 = vadd.f32 1.1920929e-07, %v1945_v34 }
 0x97c   : > { %2608 = vrsqrt.f32 %v1946_v6 }
 0x986   : > { %v2609_v35 = vpop.eup %2608 }
 0x987   : > { %v1948_v36 = vmul.f32 %v2609_v35, %v2976_v24 }
 0x989   : > { %v1949_v37 = vpack.c.bf16 %v1948_v36, %v1948_v36 }
 0x98b   : > { %2248 = vmatmul.mubr.msk.bf16.vlgmr.msra.gmra.mrb[28].mxu0 %vm304_vm0, %v1949_v37 }
 0xa5e   : > { %v2011_v46 = vpop.f32.mrb[28].mxu0 }
 0xa5f   : > { %v2249_v47 = vmul.f32 -1.442695, %v2011_v46  ;;  %v2013_v48 = vpop.f32.mrb[29].mxu0 }
 0xa60   : > { %v2015_v49 = vpop.f32.mrb[30].mxu0 }
 0xa61   : > { %2610 = vpow2.f32 %v2249_v47  ;;  %v2016_v50 = vpop.f32.mrb[31].mxu0 }
 0xa6b   : > { %v2611_v51 = vpop.eup %2610 }
 0xa6c   : > { %v2021_v52 = vadd.f32 1.0, %v2611_v51 }
 0xa6e   : > { %2612 = vrcp.f32 %v2021_v52 }
 0xa78   : > { %v2613_v53 = vpop.eup %2612 }
 0xa79   : > { %v2024_v54 = vmul.f32 %v2613_v53, %v2011_v46 }
 0xa7b   : > { %v2025_v55 = vmul.f32 %v2024_v54, %v2013_v48 }
 0xa7d   : > { %v2026_v4 = vpack.c.bf16 %v2025_v55, %v2025_v55 }
 0xa7f   : > { %2469 = vmatmul.mubr.bf16.vlgmr.msra.gmra.mrb[8].mxu1 %v2026_v4 }
 0xb52   : > { %v2125_v18 = vpop.f32.mrb[8].mxu1 }
 0xb53   : > { %v2131_v56 = vadd.f32 %v2125_v18, %v2976_v24  ;;  %v2470_v57 = vpop.f32.mrb[9].mxu1 }
 0xb54   : > { %v2128_v58 = vpop.f32.mrb[10].mxu1 }
 0xb55   : > { %v2471_v59 = vpop.f32.mrb[11].mxu1  ;;  %2132 = vst.msk [vmem:[%s296_s17] sm:$0xff] %vm304_vm0, %v2131_v56 }
 0xb56   : > { %2627 = shalt.err (!%p2624_p3)
}
 0xb57   : > { %s2628_s26 = scalar_lea.hbm %s3032_s21, 128  ;;  %s2632_s13 = scalar_lea.hbm %s3083_s8, 256 }
 0xb58   : > { %p2629_p4 = scmp.ne.s32.totalorder %s3032_s21, %s2628_s26  ;;  %p2633_p9 = scmp.lt.u32.totalorder %s3032_s21, %s3083_s8 }
 0xb59   : > { %p2634_p10 = scmp.lt.u32.totalorder %s2632_s13, %s2628_s26  ;;  %p2636_p12 = scmp.lt.u32.totalorder %s2628_s26, %s3032_s21 }
 0xb5a   : > { %p2630_p7 = pnand %p2629_p4, %p2775_p5 }
 0xb5b   : > { %p2635_p11 = por %p2634_p10, %p2633_p9 }
 0xb5c   : > { %p2631_p8 = pneg %p2630_p7 }
 0xb5d   : > { %p2637_p13 = por %p2636_p12, %p2635_p11 }
 0xb5f   : > { %p2638_p0 = pnand %p2637_p13, %p2631_p8 }
 0xb61   : > { %2641 = shalt.err (!%p2638_p0)
}
 0xb62   : > { %2504 = dma.vmem_to_hbm [thread:$0]  (%p2775_p5), %s3034_s18, 128, %s3032_s21, %s2134_s9  }
 0xb63 PF: > { %p2510_p1 = scmp.ge.s32.totalorder %s2676_s30, 2  ;;  %s2159_s20 = sand.u32 1, %s2664_s27  }
 0xb64   : > { %s2160_s22 = scalar_lea.sflag [#allocation3], %s2159_s20 }
 0xb65   : > { %p2507_p2 = pnand %p2510_p1, %p2779_p6 }
 0xb67   : > { %2659 = dma.done.wait (!%p2507_p2), %s2160_s22, 128  }
 0xb68   : > { %2661 = vsyncadd (!%p2507_p2), %s2160_s22, 4294967168  ;;  %p18_p3 = scmp.ge.s32.totalorder %s2762_s11, 4   ;;  %s3086_s27 = smov %s2668_s28 }
 0xb69   : > { %s3087_s28 = smov %s2672_s29  ;;  %s3088_s29 = smov %s2773_s14 }
 0xb6a   : > { %s3089_s30 = smov %s2762_s11  ;;  %20 = sbr.rel (!%p18_p3) target bundleno = 3 (0x3), region = 87 }
 0xb71   :  { %2165 = vsyncpa [#allocation3], 1 }
 0xb72   :  { %2167 = vsyncpa [#allocation3 + $0x1], 1 }

</bundles_post_ra>
